<compile_context>
chip_gen: v7x
topology: tpu7x:2x2x1
jax: 0.10.0
libtpu: 0.0.40
codegen_flags: <defaults>
</compile_context>

<pallas_src>
from functools import partial

import jax
import jax.numpy as jnp
from jax.experimental import pallas as pl
from jax.experimental.pallas import tpu as pltpu


# ----------------------------------------------------------------------------
# Small helpers
# ----------------------------------------------------------------------------
def _largest_divisor(n, cap):
    cap = max(1, min(n, cap))
    for c in range(cap, 0, -1):
        if n % c == 0:
            return c
    return 1


# ----------------------------------------------------------------------------
# Pallas kernels
# ----------------------------------------------------------------------------
def _pair_fused_kernel(mrow_ref, mcol_ref, t_ref, s_ref,
                       gscore_ref, lscore_ref, sqd_ref,
                       *, n_heads, sqrt_scale):
    # mrow_ref:   (1, 1, L)       attention mask (row layout)
    # mcol_ref:   (1, L, 1)       attention mask (column layout)
    # t_ref:      (1, H, L, dh)   teacher hidden states, head-major
    # s_ref:      (1, H, L, dh)   student hidden states, head-major
    # gscore_ref: (1, 1, L)       teacher softmax summed over (heads, queries)
    # lscore_ref: (1, L, L)       teacher softmax summed over heads, diag zeroed
    # sqd_ref:    (1, 1, 1)       sum over heads/L/L of (s_pair - t_pair)^2
    mrow = mrow_ref[0]                                   # (1, L)
    mcol = mcol_ref[0]                                   # (L, 1)
    mext = mcol * mrow                                   # (L, L) outer mask
    neg_bias = (1.0 - mext) * (-10000.0)                 # additive softmax bias
    L = mext.shape[0]

    lsum = jnp.zeros((L, L), jnp.float32)
    dsq_rows = jnp.zeros((L, 1), jnp.float32)

    # Static unroll over relation heads; heads are a leading (aligned) dim.
    for h in range(n_heads):
        th = (t_ref[0, h] * sqrt_scale).astype(jnp.bfloat16)   # (L, dh)
        sh = (s_ref[0, h] * sqrt_scale).astype(jnp.bfloat16)
        # A @ A^T with bf16 operands, f32 accumulation (MXU).
        t_raw = jax.lax.dot_general(th, th, (((1,), (1,)), ((), ())),
                                    preferred_element_type=jnp.float32)
        s_raw = jax.lax.dot_general(sh, sh, (((1,), (1,)), ((), ())),
                                    preferred_element_type=jnp.float32)

        # Pair MSE partial: (s_pair - t_pair)^2, lane-reduce only per head.
        d = (s_raw - t_raw) * mext
        dsq_rows = dsq_rows + jnp.sum(d * d, axis=-1, keepdims=True)

        # Teacher masked softmax (only needed for top-k selection), f32.
        z = t_raw * mext + neg_bias
        mx = jnp.max(z, axis=-1, keepdims=True)
        e = jnp.exp(z - mx)
        inv = 1.0 / jnp.sum(e, axis=-1, keepdims=True)    # exact, only L values
        lsum = lsum + e * inv

    lsum = lsum * mext                                    # hoisted p * mext

    # global_score = sum over (heads, query axis) of the softmax scores.
    gscore_ref[0] = jnp.sum(lsum, axis=0, keepdims=True)  # (1, L)

    # local_score = sum over heads, diagonal zeroed.
    row = jax.lax.broadcasted_iota(jnp.int32, (L, L), 0)
    col = jax.lax.broadcasted_iota(jnp.int32, (L, L), 1)
    lscore_ref[0] = jnp.where(row == col, 0.0, lsum)

    sqd_ref[0] = jnp.sum(dsq_rows, axis=0, keepdims=True)  # (1, 1)


def _sample_angle_kernel(x_ref, ang_ref, *, bi):
    # x_ref:   (1, B, dh)    all pooled reps for one relation head
    # ang_ref: (1, bi, B, B) angle block for the i-chunk
    x = x_ref[0]                                           # (B, dh)
    ci = pl.multiple_of(pl.program_id(1) * bi, bi)
    xi = x_ref[0, pl.ds(ci, bi), :]                        # (bi, dh)
    diff = xi[:, None, :] - x[None, :, :]                  # (bi, B, dh) f32
    sq = jnp.sum(diff * diff, axis=-1, keepdims=True)
    # F.normalize(p=2, eps=1e-12): v / max(||v||, eps) == v*rsqrt(max(||v||^2,eps^2))
    n = diff * jax.lax.rsqrt(jnp.maximum(sq, 1e-24))
    nb = n.astype(jnp.bfloat16)                            # bf16 MXU operands
    ang_ref[0] = jax.lax.dot_general(
        nb, nb, (((2,), (2,)), ((0,), (0,))),
        preferred_element_type=jnp.float32)                # (bi, B, B)


def _triplet_angle_kernel(h1_ref, h2_ref, ang_ref):
    # h1_ref:  (bb, k1, D)       gathered global-topk rows
    # h2_ref:  (bb, k1, k2, D)   gathered local-topk rows
    # ang_ref: (bb, k1, k2, k2)
    h1 = h1_ref[...]
    h2 = h2_ref[...]
    bb, k1, k2, D = h2.shape
    sd = h1[:, :, None, :] - h2                            # (bb, k1, k2, D), fused
    sd = sd.reshape(bb * k1, k2, D)
    sq = jnp.sum(sd * sd, axis=-1, keepdims=True)
    n = sd * jax.lax.rsqrt(jnp.maximum(sq, 1e-24))
    nb = n.astype(jnp.bfloat16)                            # bf16 MXU operands
    ang = jax.lax.dot_general(
        nb, nb, (((2,), (2,)), ((0,), (0,))),
        preferred_element_type=jnp.float32)                # (bb*k1, k2, k2)
    ang_ref[...] = ang.reshape(bb, k1, k2, k2)


# ----------------------------------------------------------------------------
# Pallas wrappers
# ----------------------------------------------------------------------------
def pair_fused(t_hidden, s_hidden, mask, n_heads):
    """t_hidden, s_hidden: (B, L, D); mask: (B, L).
    Returns (global_score (B,L), local_score (B,L,L), sqdiff (B,))."""
    B, L, D = t_hidden.shape
    assert D % n_heads == 0
    dh = D // n_heads
    sqrt_scale = float(dh) ** -0.25                        # sqrt(1/sqrt(dh))

    # Head-major layout so the kernel never slices across lanes.
    t4 = t_hidden.astype(jnp.float32).reshape(B, L, n_heads, dh).transpose(0, 2, 1, 3)
    s4 = s_hidden.astype(jnp.float32).reshape(B, L, n_heads, dh).transpose(0, 2, 1, 3)
    mask_f = mask.astype(jnp.float32)
    mask_row = mask_f.reshape(B, 1, L)
    mask_col = mask_f.reshape(B, L, 1)

    # Explicit scoped-VMEM budget (inputs double-buffered + (L,L) temporaries).
    est = (2 * 2 * (L * D * 4)          # t, s blocks, double-buffered
           + 2 * 2 * (2 * L * 4)        # mask blocks
           + 2 * ((L * L + L + 1) * 4)  # outputs
           + 14 * L * L * 4)            # in-kernel (L,L) temporaries
    vmem_limit = int(min(64 * 2 ** 20, max(32 * 2 ** 20, 2 * est)))

    kernel = partial(_pair_fused_kernel, n_heads=n_heads, sqrt_scale=sqrt_scale)
    gscore, lscore, sqd = pl.pallas_call(
        kernel,
        grid=(B,),
        in_specs=[
            pl.BlockSpec((1, 1, L), lambda b: (b, 0, 0)),
            pl.BlockSpec((1, L, 1), lambda b: (b, 0, 0)),
            pl.BlockSpec((1, n_heads, L, dh), lambda b: (b, 0, 0, 0)),
            pl.BlockSpec((1, n_heads, L, dh), lambda b: (b, 0, 0, 0)),
        ],
        out_specs=[
            pl.BlockSpec((1, 1, L), lambda b: (b, 0, 0)),
            pl.BlockSpec((1, L, L), lambda b: (b, 0, 0)),
            pl.BlockSpec((1, 1, 1), lambda b: (b, 0, 0)),
        ],
        out_shape=[
            jax.ShapeDtypeStruct((B, 1, L), jnp.float32),
            jax.ShapeDtypeStruct((B, L, L), jnp.float32),
            jax.ShapeDtypeStruct((B, 1, 1), jnp.float32),
        ],
        compiler_params=pltpu.CompilerParams(
            dimension_semantics=("parallel",),
            vmem_limit_bytes=vmem_limit),
    )(mask_row, mask_col, t4, s4)
    return gscore[:, 0], lscore, sqd[:, 0, 0]


def sample_angle(pooled, n_heads):
    """pooled: (B, D) -> angle (H, B, B, B)."""
    B, D = pooled.shape
    dh = D // n_heads
    x = pooled.reshape(B, n_heads, dh).transpose(1, 0, 2).astype(jnp.float32)  # (H,B,dh)

    per_i = 4 * (3 * B * dh + 2 * B * B)                   # diff + norm + out per i-row
    bi = _largest_divisor(B, max(1, (6 * 2 ** 20) // max(1, per_i)))
    grid = (n_heads, B // bi)

    return pl.pallas_call(
        partial(_sample_angle_kernel, bi=bi),
        grid=grid,
        in_specs=[pl.BlockSpec((1, B, dh), lambda h, ib: (h, 0, 0))],  # passed once
        out_specs=pl.BlockSpec((1, bi, B, B), lambda h, ib: (h, ib, 0, 0)),
        out_shape=jax.ShapeDtypeStruct((n_heads, B, B, B), jnp.float32),
        compiler_params=pltpu.CompilerParams(
            dimension_semantics=("parallel", "parallel")),
    )(x)


def triplet_angle(h1, h2):
    """h1: (B, k1, D), h2: (B, k1, k2, D) -> angle (B, k1, k2, k2).
    Subtraction + normalize + angle matmul fused; several b per grid step."""
    B, k1, D = h1.shape
    _, _, k2, _ = h2.shape
    per_b = 4 * (2 * k1 * D + 5 * k1 * k2 * D + 2 * k1 * k2 * k2)
    bb = _largest_divisor(B, max(1, (8 * 2 ** 20) // max(1, per_b)))
    grid = (B // bb,)
    return pl.pallas_call(
        _triplet_angle_kernel,
        grid=grid,
        in_specs=[
            pl.BlockSpec((bb, k1, D), lambda b: (b, 0, 0)),
            pl.BlockSpec((bb, k1, k2, D), lambda b: (b, 0, 0, 0)),
        ],
        out_specs=pl.BlockSpec((bb, k1, k2, k2), lambda b: (b, 0, 0, 0)),
        out_shape=jax.ShapeDtypeStruct((B, k1, k2, k2), jnp.float32),
        compiler_params=pltpu.CompilerParams(
            dimension_semantics=("parallel",)),
    )(h1.astype(jnp.float32), h2.astype(jnp.float32))


# ----------------------------------------------------------------------------
# Loss glue (plain JAX; mirrors the PyTorch module)
# ----------------------------------------------------------------------------
def smooth_l1(x, y):
    d = x - y
    ad = jnp.abs(d)
    return jnp.where(ad < 1.0, 0.5 * d * d, ad - 0.5)


def mean_pooling(hidden, mask):
    h = hidden * mask[:, :, None]
    return jnp.sum(h, axis=1) / jnp.sum(mask, axis=1)[:, None]


def sample_loss_fn(t_rep, s_rep, mask, n_heads):
    t_pool = mean_pooling(t_rep, mask)
    s_pool = mean_pooling(s_rep, mask)
    t_ang = jax.lax.stop_gradient(sample_angle(t_pool, n_heads))
    s_ang = sample_angle(s_pool, n_heads)
    return jnp.mean(smooth_l1(s_ang, t_ang))


def cal_tripletangleseq(hidden, mask, global_topk, local_topk):
    # n_relation_heads == 1 inside the PyTorch call; head dim added back at end.
    B, L, D = hidden.shape
    k1 = global_topk.shape[1]
    k2 = local_topk.shape[2]
    # Gathers stay in XLA (data-dependent); subtraction/normalize/angle fused in Pallas.
    hidden1 = jnp.take_along_axis(
        hidden, jnp.broadcast_to(global_topk[:, :, None], (B, k1, D)), axis=1)   # (B,k1,D)
    flat = local_topk.reshape(B, k1 * k2)
    hidden2 = jnp.take_along_axis(
        hidden, jnp.broadcast_to(flat[:, :, None], (B, k1 * k2, D)), axis=1
    ).reshape(B, k1, k2, D)                                                      # (B,k1,k2,D)
    angle = triplet_angle(hidden1, hidden2)                                      # (B,k1,k2,k2)

    mask1 = jnp.take_along_axis(mask, global_topk, axis=1)                       # (B,k1)
    ame = mask1[:, :, None] + mask[:, None, :]                                   # (B,k1,L)
    ame = jnp.take_along_axis(ame, local_topk, axis=2)                           # (B,k1,k2)
    ame_pair = (ame[:, :, :, None] * ame[:, :, None, :] == 4.0).astype(jnp.float32)

    ne_mask = (angle != 0).astype(jnp.float32)
    ne_mask = ne_mask * (1.0 - jnp.eye(k2, dtype=jnp.float32))[None, None]
    amask = ame_pair * ne_mask
    angle = angle * amask
    return angle[:, None], amask[:, None]                                        # (B,1,k1,k2,k2)


def tokenphrase_loss_fn(t_rep, s_rep, mask, n_heads, k1, k2):
    B, L, D = t_rep.shape
    k1 = min(k1, L)
    k2 = min(k2, L)
    mask_f = mask.astype(jnp.float32)
    # sum of the (B,H,L,L) extended mask == H * sum_b (sum_l mask)^2
    mext_sum = n_heads * jnp.sum(jnp.sum(mask_f, axis=1) ** 2)

    # Fused pair kernel: pair MSE partial sums + teacher top-k scores.
    gscore, lscore, sqd = pair_fused(t_rep, s_rep, mask_f, n_heads)
    loss_pair = jnp.sum(sqd) / mext_sum

    gscore = jax.lax.stop_gradient(gscore)
    lscore = jax.lax.stop_gradient(lscore)
    _, global_topk = jax.lax.top_k(gscore, k1)                     # (B, k1)
    _, local_topk_all = jax.lax.top_k(lscore, k2)                  # (B, L, k2)
    local_topk = jnp.take_along_axis(
        local_topk_all,
        jnp.broadcast_to(global_topk[:, :, None], (B, k1, k2)),
        axis=1)                                                    # (B, k1, k2)

    t_angle, _t_mask = cal_tripletangleseq(t_rep, mask_f, global_topk, local_topk)
    t_angle = jax.lax.stop_gradient(t_angle)
    s_angle, s_mask = cal_tripletangleseq(s_rep, mask_f, global_topk, local_topk)
    # TODO(synk): like the PyTorch module, this divides by sum(s_mask) (and
    # mean_pooling divides by sum(mask)), which can be zero for fully-masked inputs.
    loss_triplet = jnp.sum(smooth_l1(s_angle, t_angle)) / jnp.sum(s_mask)
    return loss_pair + loss_triplet


def mgskd_loss(t_reps, s_reps, attention_mask, *, n_relation_heads, k1, k2, M=2,
               weights=(4.0, 1.0, 1.0)):
    token_loss = jnp.float32(0.0)
    phrase_loss = jnp.float32(0.0)    # never accumulated in the reference module
    sample_loss = jnp.float32(0.0)
    for layer_id, (t_rep, s_rep) in enumerate(zip(t_reps, s_reps)):
        if layer_id < M:
            token_loss = token_loss + tokenphrase_loss_fn(
                t_rep, s_rep, attention_mask, n_relation_heads, k1, k2)
        else:
            sample_loss = sample_loss + sample_loss_fn(
                t_rep, s_rep, attention_mask, n_relation_heads)
    w1, w2, w3 = weights
    loss = w1 * sample_loss + w2 * token_loss + w3 * phrase_loss
    return loss, (sample_loss, token_loss, phrase_loss)


# ----------------------------------------------------------------------------
if __name__ == "__main__":
    # Small shapes consistent with the module: B=2, L=8, D=32, 3 layers,
    # n_relation_heads=4 (D divisible by heads), k1=k2=4, M=2.
    B, L, D = 2, 8, 32
    n_heads, k1, k2, M = 4, 4, 4, 2
    n_layers = 3

    key = jax.random.PRNGKey(0)
    keys = jax.random.split(key, 2 * n_layers)
    t_reps = [jax.random.normal(keys[i], (B, L, D), dtype=jnp.float32)
              for i in range(n_layers)]
    s_reps = [jax.random.normal(keys[n_layers + i], (B, L, D), dtype=jnp.float32)
              for i in range(n_layers)]
    attention_mask = jnp.array(
        [[1, 1, 1, 1, 1, 1, 0, 0],
         [1, 1, 1, 1, 1, 1, 1, 1]], dtype=jnp.float32)

    loss, (sample_l, token_l, phrase_l) = mgskd_loss(
        t_reps, s_reps, attention_mask,
        n_relation_heads=n_heads, k1=k1, k2=k2, M=M, weights=(4.0, 1.0, 1.0))
    jax.block_until_ready(loss)
    print("KERNEL_OK")
</pallas_src>

<mosaic_0001>
module attributes {stable_mosaic.version = 11 : i64} {
  func.func @_pair_fused_kernel(%arg0: i32, %arg1: memref<1x1x8xf32, #tpu.memory_space<vmem>>, %arg2: memref<1x8x1xf32, #tpu.memory_space<vmem>>, %arg3: memref<1x4x8x8xf32, #tpu.memory_space<vmem>>, %arg4: memref<1x4x8x8xf32, #tpu.memory_space<vmem>>, %arg5: memref<1x1x8xf32, #tpu.memory_space<vmem>>, %arg6: memref<1x8x8xf32, #tpu.memory_space<vmem>>, %arg7: memref<1x1x1xf32, #tpu.memory_space<vmem>>) attributes {dimension_semantics = [#tpu.dimension_semantics<parallel>], iteration_bounds = array<i64: 2>, scalar_prefetch = 0 : i64, scratch_operands = 0 : i64, tpu.core_type = #tpu.core_type<tc>, window_params = [{transform_indices = @transform_0, window_bounds = array<i64: 1, 1, 8>}, {transform_indices = @transform_1, window_bounds = array<i64: 1, 8, 1>}, {transform_indices = @transform_2, window_bounds = array<i64: 1, 4, 8, 8>}, {transform_indices = @transform_3, window_bounds = array<i64: 1, 4, 8, 8>}, {transform_indices = @transform_4, window_bounds = array<i64: 1, 1, 8>}, {transform_indices = @transform_5, window_bounds = array<i64: 1, 8, 8>}, {transform_indices = @transform_6, window_bounds = array<i64: 1, 1, 1>}]} {
    %c0 = arith.constant 0 : index
    %c0_0 = arith.constant 0 : index
    %c0_1 = arith.constant 0 : index
    %0 = vector.load %arg1[%c0, %c0_0, %c0_1] : memref<1x1x8xf32, #tpu.memory_space<vmem>>, vector<1x1x8xf32>
    %1 = vector.shape_cast %0 : vector<1x1x8xf32> to vector<1x8xf32>
    %c0_2 = arith.constant 0 : index
    %c0_3 = arith.constant 0 : index
    %c0_4 = arith.constant 0 : index
    %2 = vector.load %arg2[%c0_2, %c0_3, %c0_4] : memref<1x8x1xf32, #tpu.memory_space<vmem>>, vector<1x8x1xf32>
    %3 = vector.shape_cast %2 : vector<1x8x1xf32> to vector<8x1xf32>
    %4 = vector.broadcast %3 : vector<8x1xf32> to vector<8x8xf32>
    %5 = vector.broadcast %1 : vector<1x8xf32> to vector<8x8xf32>
    %6 = arith.mulf %4, %5 : vector<8x8xf32>
    %cst = arith.constant 1.000000e+00 : f32
    %7 = vector.broadcast %cst : f32 to vector<8x8xf32>
    %8 = arith.subf %7, %6 : vector<8x8xf32>
    %cst_5 = arith.constant -1.000000e+04 : f32
    %9 = vector.broadcast %cst_5 : f32 to vector<8x8xf32>
    %10 = arith.mulf %8, %9 : vector<8x8xf32>
    %cst_6 = arith.constant 0.000000e+00 : f32
    %11 = vector.broadcast %cst_6 : f32 to vector<8x8xf32>
    %cst_7 = arith.constant 0.000000e+00 : f32
    %12 = vector.broadcast %cst_7 : f32 to vector<8x1xf32>
    %c0_8 = arith.constant 0 : index
    %c0_9 = arith.constant 0 : index
    %c0_10 = arith.constant 0 : index
    %c0_11 = arith.constant 0 : index
    %13 = vector.load %arg3[%c0_8, %c0_9, %c0_10, %c0_11] : memref<1x4x8x8xf32, #tpu.memory_space<vmem>>, vector<1x1x8x8xf32>
    %14 = vector.shape_cast %13 : vector<1x1x8x8xf32> to vector<8x8xf32>
    %cst_12 = arith.constant 0.594603539 : f32
    %15 = vector.broadcast %cst_12 : f32 to vector<8x8xf32>
    %16 = arith.mulf %14, %15 : vector<8x8xf32>
    %17 = arith.truncf %16 : vector<8x8xf32> to vector<8x8xbf16>
    %c0_13 = arith.constant 0 : index
    %c0_14 = arith.constant 0 : index
    %c0_15 = arith.constant 0 : index
    %c0_16 = arith.constant 0 : index
    %18 = vector.load %arg4[%c0_13, %c0_14, %c0_15, %c0_16] : memref<1x4x8x8xf32, #tpu.memory_space<vmem>>, vector<1x1x8x8xf32>
    %19 = vector.shape_cast %18 : vector<1x1x8x8xf32> to vector<8x8xf32>
    %cst_17 = arith.constant 0.594603539 : f32
    %20 = vector.broadcast %cst_17 : f32 to vector<8x8xf32>
    %21 = arith.mulf %19, %20 : vector<8x8xf32>
    %22 = arith.truncf %21 : vector<8x8xf32> to vector<8x8xbf16>
    %cst_18 = arith.constant dense<0.000000e+00> : vector<8x8xf32>
    %23 = tpu.matmul %17, %17, %cst_18 {dimension_numbers = #tpu.dot_dimension_numbers<[1], [1], [0], [0], [0, 0, 1, 0], [], []>} : vector<8x8xbf16>, vector<8x8xbf16>, vector<8x8xf32> -> vector<8x8xf32>
    %cst_19 = arith.constant dense<0.000000e+00> : vector<8x8xf32>
    %24 = tpu.matmul %22, %22, %cst_19 {dimension_numbers = #tpu.dot_dimension_numbers<[1], [1], [0], [0], [0, 0, 1, 0], [], []>} : vector<8x8xbf16>, vector<8x8xbf16>, vector<8x8xf32> -> vector<8x8xf32>
    %25 = arith.subf %24, %23 : vector<8x8xf32>
    %26 = arith.mulf %25, %6 : vector<8x8xf32>
    %27 = arith.mulf %26, %26 : vector<8x8xf32>
    %cst_20 = arith.constant dense<0.000000e+00> : vector<8xf32>
    %28 = vector.multi_reduction <add>, %27, %cst_20 [1] : vector<8x8xf32> to vector<8xf32>
    %29 = vector.shape_cast %28 : vector<8xf32> to vector<8x1xf32>
    %30 = arith.addf %12, %29 : vector<8x1xf32>
    %31 = arith.mulf %23, %6 : vector<8x8xf32>
    %32 = arith.addf %31, %10 : vector<8x8xf32>
    %cst_21 = arith.constant dense<0xFF800000> : vector<8xf32>
    %33 = vector.multi_reduction <maximumf>, %32, %cst_21 [1] : vector<8x8xf32> to vector<8xf32>
    %34 = vector.shape_cast %33 : vector<8xf32> to vector<8x1xf32>
    %35 = vector.broadcast %34 : vector<8x1xf32> to vector<8x8xf32>
    %36 = arith.subf %32, %35 : vector<8x8xf32>
    %37 = math.exp %36 : vector<8x8xf32>
    %cst_22 = arith.constant dense<0.000000e+00> : vector<8xf32>
    %38 = vector.multi_reduction <add>, %37, %cst_22 [1] : vector<8x8xf32> to vector<8xf32>
    %39 = vector.shape_cast %38 : vector<8xf32> to vector<8x1xf32>
    %cst_23 = arith.constant 1.000000e+00 : f32
    %40 = vector.broadcast %cst_23 : f32 to vector<8x1xf32>
    %41 = arith.divf %40, %39 : vector<8x1xf32>
    %42 = vector.broadcast %41 : vector<8x1xf32> to vector<8x8xf32>
    %43 = arith.mulf %37, %42 : vector<8x8xf32>
    %44 = arith.addf %11, %43 : vector<8x8xf32>
    %c0_24 = arith.constant 0 : index
    %c1 = arith.constant 1 : index
    %c0_25 = arith.constant 0 : index
    %c0_26 = arith.constant 0 : index
    %45 = vector.load %arg3[%c0_24, %c1, %c0_25, %c0_26] : memref<1x4x8x8xf32, #tpu.memory_space<vmem>>, vector<1x1x8x8xf32>
    %46 = vector.shape_cast %45 : vector<1x1x8x8xf32> to vector<8x8xf32>
    %cst_27 = arith.constant 0.594603539 : f32
    %47 = vector.broadcast %cst_27 : f32 to vector<8x8xf32>
    %48 = arith.mulf %46, %47 : vector<8x8xf32>
    %49 = arith.truncf %48 : vector<8x8xf32> to vector<8x8xbf16>
    %c0_28 = arith.constant 0 : index
    %c1_29 = arith.constant 1 : index
    %c0_30 = arith.constant 0 : index
    %c0_31 = arith.constant 0 : index
    %50 = vector.load %arg4[%c0_28, %c1_29, %c0_30, %c0_31] : memref<1x4x8x8xf32, #tpu.memory_space<vmem>>, vector<1x1x8x8xf32>
    %51 = vector.shape_cast %50 : vector<1x1x8x8xf32> to vector<8x8xf32>
    %cst_32 = arith.constant 0.594603539 : f32
    %52 = vector.broadcast %cst_32 : f32 to vector<8x8xf32>
    %53 = arith.mulf %51, %52 : vector<8x8xf32>
    %54 = arith.truncf %53 : vector<8x8xf32> to vector<8x8xbf16>
    %cst_33 = arith.constant dense<0.000000e+00> : vector<8x8xf32>
    %55 = tpu.matmul %49, %49, %cst_33 {dimension_numbers = #tpu.dot_dimension_numbers<[1], [1], [0], [0], [0, 0, 1, 0], [], []>} : vector<8x8xbf16>, vector<8x8xbf16>, vector<8x8xf32> -> vector<8x8xf32>
    %cst_34 = arith.constant dense<0.000000e+00> : vector<8x8xf32>
    %56 = tpu.matmul %54, %54, %cst_34 {dimension_numbers = #tpu.dot_dimension_numbers<[1], [1], [0], [0], [0, 0, 1, 0], [], []>} : vector<8x8xbf16>, vector<8x8xbf16>, vector<8x8xf32> -> vector<8x8xf32>
    %57 = arith.subf %56, %55 : vector<8x8xf32>
    %58 = arith.mulf %57, %6 : vector<8x8xf32>
    %59 = arith.mulf %58, %58 : vector<8x8xf32>
    %cst_35 = arith.constant dense<0.000000e+00> : vector<8xf32>
    %60 = vector.multi_reduction <add>, %59, %cst_35 [1] : vector<8x8xf32> to vector<8xf32>
    %61 = vector.shape_cast %60 : vector<8xf32> to vector<8x1xf32>
    %62 = arith.addf %30, %61 : vector<8x1xf32>
    %63 = arith.mulf %55, %6 : vector<8x8xf32>
    %64 = arith.addf %63, %10 : vector<8x8xf32>
    %cst_36 = arith.constant dense<0xFF800000> : vector<8xf32>
    %65 = vector.multi_reduction <maximumf>, %64, %cst_36 [1] : vector<8x8xf32> to vector<8xf32>
    %66 = vector.shape_cast %65 : vector<8xf32> to vector<8x1xf32>
    %67 = vector.broadcast %66 : vector<8x1xf32> to vector<8x8xf32>
    %68 = arith.subf %64, %67 : vector<8x8xf32>
    %69 = math.exp %68 : vector<8x8xf32>
    %cst_37 = arith.constant dense<0.000000e+00> : vector<8xf32>
    %70 = vector.multi_reduction <add>, %69, %cst_37 [1] : vector<8x8xf32> to vector<8xf32>
    %71 = vector.shape_cast %70 : vector<8xf32> to vector<8x1xf32>
    %cst_38 = arith.constant 1.000000e+00 : f32
    %72 = vector.broadcast %cst_38 : f32 to vector<8x1xf32>
    %73 = arith.divf %72, %71 : vector<8x1xf32>
    %74 = vector.broadcast %73 : vector<8x1xf32> to vector<8x8xf32>
    %75 = arith.mulf %69, %74 : vector<8x8xf32>
    %76 = arith.addf %44, %75 : vector<8x8xf32>
    %c0_39 = arith.constant 0 : index
    %c2 = arith.constant 2 : index
    %c0_40 = arith.constant 0 : index
    %c0_41 = arith.constant 0 : index
    %77 = vector.load %arg3[%c0_39, %c2, %c0_40, %c0_41] : memref<1x4x8x8xf32, #tpu.memory_space<vmem>>, vector<1x1x8x8xf32>
    %78 = vector.shape_cast %77 : vector<1x1x8x8xf32> to vector<8x8xf32>
    %cst_42 = arith.constant 0.594603539 : f32
    %79 = vector.broadcast %cst_42 : f32 to vector<8x8xf32>
    %80 = arith.mulf %78, %79 : vector<8x8xf32>
    %81 = arith.truncf %80 : vector<8x8xf32> to vector<8x8xbf16>
    %c0_43 = arith.constant 0 : index
    %c2_44 = arith.constant 2 : index
    %c0_45 = arith.constant 0 : index
    %c0_46 = arith.constant 0 : index
    %82 = vector.load %arg4[%c0_43, %c2_44, %c0_45, %c0_46] : memref<1x4x8x8xf32, #tpu.memory_space<vmem>>, vector<1x1x8x8xf32>
    %83 = vector.shape_cast %82 : vector<1x1x8x8xf32> to vector<8x8xf32>
    %cst_47 = arith.constant 0.594603539 : f32
    %84 = vector.broadcast %cst_47 : f32 to vector<8x8xf32>
    %85 = arith.mulf %83, %84 : vector<8x8xf32>
    %86 = arith.truncf %85 : vector<8x8xf32> to vector<8x8xbf16>
    %cst_48 = arith.constant dense<0.000000e+00> : vector<8x8xf32>
    %87 = tpu.matmul %81, %81, %cst_48 {dimension_numbers = #tpu.dot_dimension_numbers<[1], [1], [0], [0], [0, 0, 1, 0], [], []>} : vector<8x8xbf16>, vector<8x8xbf16>, vector<8x8xf32> -> vector<8x8xf32>
    %cst_49 = arith.constant dense<0.000000e+00> : vector<8x8xf32>
    %88 = tpu.matmul %86, %86, %cst_49 {dimension_numbers = #tpu.dot_dimension_numbers<[1], [1], [0], [0], [0, 0, 1, 0], [], []>} : vector<8x8xbf16>, vector<8x8xbf16>, vector<8x8xf32> -> vector<8x8xf32>
    %89 = arith.subf %88, %87 : vector<8x8xf32>
    %90 = arith.mulf %89, %6 : vector<8x8xf32>
    %91 = arith.mulf %90, %90 : vector<8x8xf32>
    %cst_50 = arith.constant dense<0.000000e+00> : vector<8xf32>
    %92 = vector.multi_reduction <add>, %91, %cst_50 [1] : vector<8x8xf32> to vector<8xf32>
    %93 = vector.shape_cast %92 : vector<8xf32> to vector<8x1xf32>
    %94 = arith.addf %62, %93 : vector<8x1xf32>
    %95 = arith.mulf %87, %6 : vector<8x8xf32>
    %96 = arith.addf %95, %10 : vector<8x8xf32>
    %cst_51 = arith.constant dense<0xFF800000> : vector<8xf32>
    %97 = vector.multi_reduction <maximumf>, %96, %cst_51 [1] : vector<8x8xf32> to vector<8xf32>
    %98 = vector.shape_cast %97 : vector<8xf32> to vector<8x1xf32>
    %99 = vector.broadcast %98 : vector<8x1xf32> to vector<8x8xf32>
    %100 = arith.subf %96, %99 : vector<8x8xf32>
    %101 = math.exp %100 : vector<8x8xf32>
    %cst_52 = arith.constant dense<0.000000e+00> : vector<8xf32>
    %102 = vector.multi_reduction <add>, %101, %cst_52 [1] : vector<8x8xf32> to vector<8xf32>
    %103 = vector.shape_cast %102 : vector<8xf32> to vector<8x1xf32>
    %cst_53 = arith.constant 1.000000e+00 : f32
    %104 = vector.broadcast %cst_53 : f32 to vector<8x1xf32>
    %105 = arith.divf %104, %103 : vector<8x1xf32>
    %106 = vector.broadcast %105 : vector<8x1xf32> to vector<8x8xf32>
    %107 = arith.mulf %101, %106 : vector<8x8xf32>
    %108 = arith.addf %76, %107 : vector<8x8xf32>
    %c0_54 = arith.constant 0 : index
    %c3 = arith.constant 3 : index
    %c0_55 = arith.constant 0 : index
    %c0_56 = arith.constant 0 : index
    %109 = vector.load %arg3[%c0_54, %c3, %c0_55, %c0_56] : memref<1x4x8x8xf32, #tpu.memory_space<vmem>>, vector<1x1x8x8xf32>
    %110 = vector.shape_cast %109 : vector<1x1x8x8xf32> to vector<8x8xf32>
    %cst_57 = arith.constant 0.594603539 : f32
    %111 = vector.broadcast %cst_57 : f32 to vector<8x8xf32>
    %112 = arith.mulf %110, %111 : vector<8x8xf32>
    %113 = arith.truncf %112 : vector<8x8xf32> to vector<8x8xbf16>
    %c0_58 = arith.constant 0 : index
    %c3_59 = arith.constant 3 : index
    %c0_60 = arith.constant 0 : index
    %c0_61 = arith.constant 0 : index
    %114 = vector.load %arg4[%c0_58, %c3_59, %c0_60, %c0_61] : memref<1x4x8x8xf32, #tpu.memory_space<vmem>>, vector<1x1x8x8xf32>
    %115 = vector.shape_cast %114 : vector<1x1x8x8xf32> to vector<8x8xf32>
    %cst_62 = arith.constant 0.594603539 : f32
    %116 = vector.broadcast %cst_62 : f32 to vector<8x8xf32>
    %117 = arith.mulf %115, %116 : vector<8x8xf32>
    %118 = arith.truncf %117 : vector<8x8xf32> to vector<8x8xbf16>
    %cst_63 = arith.constant dense<0.000000e+00> : vector<8x8xf32>
    %119 = tpu.matmul %113, %113, %cst_63 {dimension_numbers = #tpu.dot_dimension_numbers<[1], [1], [0], [0], [0, 0, 1, 0], [], []>} : vector<8x8xbf16>, vector<8x8xbf16>, vector<8x8xf32> -> vector<8x8xf32>
    %cst_64 = arith.constant dense<0.000000e+00> : vector<8x8xf32>
    %120 = tpu.matmul %118, %118, %cst_64 {dimension_numbers = #tpu.dot_dimension_numbers<[1], [1], [0], [0], [0, 0, 1, 0], [], []>} : vector<8x8xbf16>, vector<8x8xbf16>, vector<8x8xf32> -> vector<8x8xf32>
    %121 = arith.subf %120, %119 : vector<8x8xf32>
    %122 = arith.mulf %121, %6 : vector<8x8xf32>
    %123 = arith.mulf %122, %122 : vector<8x8xf32>
    %cst_65 = arith.constant dense<0.000000e+00> : vector<8xf32>
    %124 = vector.multi_reduction <add>, %123, %cst_65 [1] : vector<8x8xf32> to vector<8xf32>
    %125 = vector.shape_cast %124 : vector<8xf32> to vector<8x1xf32>
    %126 = arith.addf %94, %125 : vector<8x1xf32>
    %127 = arith.mulf %119, %6 : vector<8x8xf32>
    %128 = arith.addf %127, %10 : vector<8x8xf32>
    %cst_66 = arith.constant dense<0xFF800000> : vector<8xf32>
    %129 = vector.multi_reduction <maximumf>, %128, %cst_66 [1] : vector<8x8xf32> to vector<8xf32>
    %130 = vector.shape_cast %129 : vector<8xf32> to vector<8x1xf32>
    %131 = vector.broadcast %130 : vector<8x1xf32> to vector<8x8xf32>
    %132 = arith.subf %128, %131 : vector<8x8xf32>
    %133 = math.exp %132 : vector<8x8xf32>
    %cst_67 = arith.constant dense<0.000000e+00> : vector<8xf32>
    %134 = vector.multi_reduction <add>, %133, %cst_67 [1] : vector<8x8xf32> to vector<8xf32>
    %135 = vector.shape_cast %134 : vector<8xf32> to vector<8x1xf32>
    %cst_68 = arith.constant 1.000000e+00 : f32
    %136 = vector.broadcast %cst_68 : f32 to vector<8x1xf32>
    %137 = arith.divf %136, %135 : vector<8x1xf32>
    %138 = vector.broadcast %137 : vector<8x1xf32> to vector<8x8xf32>
    %139 = arith.mulf %133, %138 : vector<8x8xf32>
    %140 = arith.addf %108, %139 : vector<8x8xf32>
    %141 = arith.mulf %140, %6 : vector<8x8xf32>
    %cst_69 = arith.constant dense<0.000000e+00> : vector<8xf32>
    %142 = vector.multi_reduction <add>, %141, %cst_69 [0] : vector<8x8xf32> to vector<8xf32>
    %143 = vector.shape_cast %142 : vector<8xf32> to vector<1x8xf32>
    %c0_70 = arith.constant 0 : index
    %c0_71 = arith.constant 0 : index
    %c0_72 = arith.constant 0 : index
    %144 = vector.load %arg5[%c0_70, %c0_71, %c0_72] : memref<1x1x8xf32, #tpu.memory_space<vmem>>, vector<1x1x8xf32>
    %145 = vector.shape_cast %144 : vector<1x1x8xf32> to vector<1x8xf32>
    %146 = vector.shape_cast %143 : vector<1x8xf32> to vector<1x1x8xf32>
    tpu.vector_store %arg5[%c0_70, %c0_71, %c0_72], %146 {strides = array<i32>} : memref<1x1x8xf32, #tpu.memory_space<vmem>>, vector<1x1x8xf32>,
    %147 = tpu.iota {dimensions = array<i32: 0>} : vector<8x8xi32>
    %148 = tpu.iota {dimensions = array<i32: 1>} : vector<8x8xi32>
    %149 = arith.cmpi eq, %147, %148 : vector<8x8xi32>
    %cst_73 = arith.constant 0.000000e+00 : f32
    %150 = vector.broadcast %cst_73 : f32 to vector<8x8xf32>
    %151 = arith.select %149, %150, %141 : vector<8x8xi1>, vector<8x8xf32>
    %c0_74 = arith.constant 0 : index
    %c0_75 = arith.constant 0 : index
    %c0_76 = arith.constant 0 : index
    %152 = vector.load %arg6[%c0_74, %c0_75, %c0_76] : memref<1x8x8xf32, #tpu.memory_space<vmem>>, vector<1x8x8xf32>
    %153 = vector.shape_cast %152 : vector<1x8x8xf32> to vector<8x8xf32>
    %154 = vector.shape_cast %151 : vector<8x8xf32> to vector<1x8x8xf32>
    tpu.vector_store %arg6[%c0_74, %c0_75, %c0_76], %154 {strides = array<i32>} : memref<1x8x8xf32, #tpu.memory_space<vmem>>, vector<1x8x8xf32>,
    %cst_77 = arith.constant dense<0.000000e+00> : vector<1xf32>
    %155 = vector.multi_reduction <add>, %126, %cst_77 [0] : vector<8x1xf32> to vector<1xf32>
    %156 = vector.shape_cast %155 : vector<1xf32> to vector<1x1xf32>
    %c0_78 = arith.constant 0 : index
    %c0_79 = arith.constant 0 : index
    %c0_80 = arith.constant 0 : index
    %157 = vector.load %arg7[%c0_78, %c0_79, %c0_80] : memref<1x1x1xf32, #tpu.memory_space<vmem>>, vector<1x1x1xf32>
    %158 = vector.shape_cast %157 : vector<1x1x1xf32> to vector<1x1xf32>
    %159 = vector.shape_cast %156 : vector<1x1xf32> to vector<1x1x1xf32>
    tpu.vector_store %arg7[%c0_78, %c0_79, %c0_80], %159 {strides = array<i32>} : memref<1x1x1xf32, #tpu.memory_space<vmem>>, vector<1x1x1xf32>,
    return
  }
  func.func @transform_0(%arg0: i32) -> (i32, i32, i32) {
    %c0_i32 = arith.constant 0 : i32
    %c0_i32_0 = arith.constant 0 : i32
    %c0_i32_1 = arith.constant 0 : i32
    return %arg0, %c0_i32, %c0_i32_0 : i32, i32, i32
  }
  func.func @transform_1(%arg0: i32) -> (i32, i32, i32) {
    %c0_i32 = arith.constant 0 : i32
    %c0_i32_0 = arith.constant 0 : i32
    %c0_i32_1 = arith.constant 0 : i32
    return %arg0, %c0_i32, %c0_i32_0 : i32, i32, i32
  }
  func.func @transform_2(%arg0: i32) -> (i32, i32, i32, i32) {
    %c0_i32 = arith.constant 0 : i32
    %c0_i32_0 = arith.constant 0 : i32
    %c0_i32_1 = arith.constant 0 : i32
    %c0_i32_2 = arith.constant 0 : i32
    return %arg0, %c0_i32, %c0_i32_0, %c0_i32_1 : i32, i32, i32, i32
  }
  func.func @transform_3(%arg0: i32) -> (i32, i32, i32, i32) {
    %c0_i32 = arith.constant 0 : i32
    %c0_i32_0 = arith.constant 0 : i32
    %c0_i32_1 = arith.constant 0 : i32
    %c0_i32_2 = arith.constant 0 : i32
    return %arg0, %c0_i32, %c0_i32_0, %c0_i32_1 : i32, i32, i32, i32
  }
  func.func @transform_4(%arg0: i32) -> (i32, i32, i32) {
    %c0_i32 = arith.constant 0 : i32
    %c0_i32_0 = arith.constant 0 : i32
    %c0_i32_1 = arith.constant 0 : i32
    return %arg0, %c0_i32, %c0_i32_0 : i32, i32, i32
  }
  func.func @transform_5(%arg0: i32) -> (i32, i32, i32) {
    %c0_i32 = arith.constant 0 : i32
    %c0_i32_0 = arith.constant 0 : i32
    %c0_i32_1 = arith.constant 0 : i32
    return %arg0, %c0_i32, %c0_i32_0 : i32, i32, i32
  }
  func.func @transform_6(%arg0: i32) -> (i32, i32, i32) {
    %c0_i32 = arith.constant 0 : i32
    %c0_i32_0 = arith.constant 0 : i32
    %c0_i32_1 = arith.constant 0 : i32
    return %arg0, %c0_i32, %c0_i32_0 : i32, i32, i32
  }
}

</mosaic_0001>

<bundles_post_ra>
// kernel: tpu_custom_call.1
= control target key start
LH: loop header
LB: loop body
LE: loop exit
PB: predicated region body
PF: predicated region fallthrough
CT: control target
= control target key end

     0   :  { %s1815_s0 = inlined_call_operand.vmem [shape: f32[2,1,8], index: 0, kind: input, shape index: {}]   ;;  %s1816_s1 = inlined_call_operand.vmem [shape: f32[2,8,1], index: 1, kind: input, shape index: {}]   ;;  %s1817_s2 = inlined_call_operand.hbm [shape: f32[2,4,8,8], index: 2, kind: input, shape index: {}]   ;;  %s1818_s3 = inlined_call_operand.hbm [shape: f32[2,4,8,8], index: 3, kind: input, shape index: {}]   ;;  %s1819_s4 = inlined_call_operand.hbm [shape: f32[2,1,8], index: 4, kind: output, shape index: {0}]   ;;  %s1820_s5 = inlined_call_operand.hbm [shape: f32[2,8,8], index: 5, kind: output, shape index: {1}]   ;;  %s1821_s6 = inlined_call_operand.vmem [shape: f32[2,1,1], index: 6, kind: output, shape index: {2}]  }
   0x1   :  { %1825 = sst [smem:[#allocation14_spill]] %s1817_s2 }
   0x2   :  { %12 = vsyncpa [#allocation3], 0 }
   0x3   :  { %14 = vsyncpa [#allocation3 + $0x1], 0 }
   0x4   :  { %15 = vsyncpa [#allocation6], 0 }
   0x5   :  { %17 = vsyncpa [#allocation6 + $0x1], 0 }
   0x6   :  { %18 = vsyncpa [#allocation4], 0 }
   0x7   :  { %20 = vsyncpa [#allocation4 + $0x1], 0 }
   0x8   :  { %21 = vsyncpa [#allocation9], 0 }
   0x9   :  { %23 = vsyncpa [#allocation9 + $0x1], 0  ;;  %s1448_s21 = smov 0   ;;  %s1450_s22 = smov 0  }
   0xa   :  { %s1452_s23 = smov 0   ;;  %s1454_s24 = smov 0  }
   0xb LB: > { %s1469_s25 = sadd.s32 4294967295, %s1402_s24   ;;  %s1062_s26 = sadd.s32 4294967294, %s1402_s24   ;;  %s1402_s24 = sphi %s1454_s24, %s1841_s24   ;;  %s1398_s23 = sphi %s1452_s23, %s1840_s23   ;;  %s1394_s22 = sphi %s1450_s22, %s1839_s22   ;;  %s1390_s21 = sphi %s1448_s21, %s1838_s21  }
   0xc   : > { %s1473_s27 = sadd.s32 1, %s1402_s24   ;;  %s88_s28 = sadd.s32 1, %s1398_s23 }
   0xd   : > { %s85_s29 = ssub.s32 %s1402_s24, %s1473_s27  ;;  %p95_p0 = scmp.ne.s32.totalorder %s1398_s23, %s1394_s22 }
   0xe   : > { %p86_p1 = scmp.eq.s32.totalorder %s85_s29, 0  ;;  %p96_p2 = scmp.eq.s32.totalorder %s1402_s24, 0 }
   0xf   : > { %p101_p3 = scmp.ne.s32.totalorder %s1394_s22, %s1390_s21  ;;  %p102_p4 = scmp.eq.s32.totalorder %s1469_s25, 0 }
  0x10   : > { %s1485_s30 = scalar_select %p86_p1, %s1398_s23, %s88_s28  }
  0x11   : > { %p1487_p5 = por %p96_p2, %p95_p0  ;;  %p1491_p6 = por %p102_p4, %p101_p3 }
  0x12   : > { %p151_p7 = scmp.eq.s32.totalorder %s1469_s25, 1  ;;  %p157_p8 = scmp.eq.s32.totalorder %s1062_s26, 1 }
  0x13   : > { %s1827_s8 = scalar_select %p1491_p6, 1, 0 }
  0x14   : > { %p1184_p10 = scmp.lt.s32.totalorder %s1402_s24, 2  ;;  %p1498_p11 = por %p151_p7, %p95_p0 }
  0x15   : > { %p1502_p12 = por %p157_p8, %p101_p3  ;;  %s1507_s11 = sand.u32 1, %s1398_s23  }
  0x16   : > { %s1828_s9 = scalar_select %p1498_p11, 1, 0 }
  0x17   : > { %s1829_s10 = scalar_select %p1502_p12, 1, 0 }
  0x18   : > { %s1096_s12 = sshll.u32 %s1402_s24, 9  ;;  %s1065_s13 = sshll.u32 %s1507_s11, 5 }
  0x19   : > { %s1830_s2 = sld [smem:[#allocation14_spill]]  ;;  %s246_s17 = scalar_lea.vmem [#allocation2], %s1065_s13 }
  0x1a   : > { %s253_s18 = sshll.u32 %s246_s17, 4  ;;  %p1522_p13 = pnand %p1184_p10, %p1487_p5  ;;  %s1526_s18 = int_to_ptr.vmem [resolvable:$true] %s253_s18 }
  0x1b   : > { %s243_s20 = scalar_lea.sflag [#allocation3], %s1507_s11 }
  0x1c   : > { %p1242_p1 = pneg %p1522_p13 }
  0x1f   : > { %s1516_s16 = scalar_lea.hbm %s1830_s2, %s1096_s12  ;;  %s1245_s7 = scalar_lea.hbm %s1830_s2, 1024 }
  0x20   : > { %s1240_s26 = scalar_lea.hbm %s1516_s16, 512  ;;  %p1246_p4 = scmp.lt.u32.totalorder %s1516_s16, %s1830_s2 }
  0x21   : > { %p1241_p0 = scmp.ne.s32.totalorder %s1516_s16, %s1240_s26  ;;  %p1247_p5 = scmp.lt.u32.totalorder %s1245_s7, %s1240_s26 }
  0x22   : > { %p1249_p8 = scmp.lt.u32.totalorder %s1240_s26, %s1516_s16 }
  0x23   : > { %p1243_p2 = pnand %p1242_p1, %p1241_p0  ;;  %p1248_p7 = por %p1247_p5, %p1246_p4 }
  0x25   : > { %p1244_p3 = pneg %p1243_p2  ;;  %p1250_p10 = por %p1249_p8, %p1248_p7 }
  0x27   : > { %p1251_p9 = pnand %p1250_p10, %p1244_p3 }
  0x29   : > { %1254 = shalt.err (!%p1251_p9)
}
  0x2a   : > { %s1255_s17 = scalar_lea.vmem %s1526_s18, 512  ;;  %s1404_s28 = smov [#allocation2]  }
  0x2b   : > { %p1256_p0 = scmp.ne.s32.totalorder %s1526_s18, %s1255_s17  ;;  %s1260_s29 = sshll.u32 %s1404_s28, 4  ;;  %s1261_s29 = int_to_ptr.vmem [resolvable:$false] %s1260_s29 }
  0x2c   : > { %s1262_s14 = scalar_lea.vmem %s1261_s29, 1024  ;;  %p1263_p11 = scmp.lt.s32.totalorder %s1526_s18, %s1261_s29 }
  0x2d   : > { %p1258_p2 = pnand %p1256_p0, %p1242_p1  ;;  %p1264_p4 = scmp.lt.s32.totalorder %s1262_s14, %s1255_s17 }
  0x2f   : > { %p1259_p12 = pneg %p1258_p2  ;;  %p1265_p5 = por %p1264_p4, %p1263_p11 }
  0x31   : > { %p1266_p7 = pnand %p1265_p5, %p1259_p12 }
  0x33   : > { %1269 = shalt.err (!%p1266_p7)
}
  0x34   : > { %s1823_s26 = smov 128   ;;  %s1406_s7 = smov 8  }
  0x35   : > { %1173 = dma.hbm_to_vmem [thread:$0]  (!%p1522_p13), %s1516_s16, 512, %s1526_s18, %s243_s20, %s1823_s26, %s1823_s26, %s1406_s7  }
  0x36   : > { %p1071_p9 = scmp.ge.s32.totalorder %s1402_s24, 1  ;;  %p282_p11 = scmp.lt.s32.totalorder %s1402_s24, 3 }
  0x37   : > { %s1570_s29 = scalar_lea.hbm %s1818_s3, %s1096_s12  ;;  %s267_s14 = scalar_lea.vmem [#allocation5], %s1065_s13 }
  0x38   : > { %p1561_p12 = pnand %p1071_p9, %p282_p11  ;;  %s274_s2 = sshll.u32 %s267_s14, 4  ;;  %s1574_s2 = int_to_ptr.vmem [resolvable:$true] %s274_s2 }
  0x39   : > { %s264_s16 = scalar_lea.sflag [#allocation6], %s1507_s11  ;;  %s1270_s18 = scalar_lea.hbm %s1570_s29, 512 }
  0x3a   : > { %p1271_p3 = scmp.ne.s32.totalorder %s1570_s29, %s1270_s18  ;;  %s1275_s12 = scalar_lea.hbm %s1818_s3, 1024 }
  0x3b   : > { %p1276_p0 = scmp.lt.u32.totalorder %s1570_s29, %s1818_s3  ;;  %p1277_p2 = scmp.lt.u32.totalorder %s1275_s12, %s1270_s18 }
  0x3c   : > { %p1273_p8 = pnand %p1271_p3, %p1242_p1  ;;  %p1279_p5 = scmp.lt.u32.totalorder %s1270_s18, %s1570_s29 }
  0x3d   : > { %p1278_p4 = por %p1277_p2, %p1276_p0 }
  0x3e   : > { %p1274_p10 = pneg %p1273_p8 }
  0x3f   : > { %p1280_p7 = por %p1279_p5, %p1278_p4 }
  0x41   : > { %p1281_p9 = pnand %p1280_p7, %p1274_p10 }
  0x43   : > { %1284 = shalt.err (!%p1281_p9)
}
  0x44   : > { %s1285_s13 = scalar_lea.vmem %s1574_s2, 512  ;;  %s1407_s14 = smov [#allocation5]  }
  0x45   : > { %p1286_p11 = scmp.ne.s32.totalorder %s1574_s2, %s1285_s13  ;;  %s1290_s20 = sshll.u32 %s1407_s14, 4  ;;  %s1291_s20 = int_to_ptr.vmem [resolvable:$false] %s1290_s20 }
  0x46   : > { %s1292_s26 = scalar_lea.vmem %s1291_s20, 1024  ;;  %p1293_p6 = scmp.lt.s32.totalorder %s1574_s2, %s1291_s20 }
  0x47   : > { %p1288_p3 = pnand %p1286_p11, %p1242_p1  ;;  %p1294_p0 = scmp.lt.s32.totalorder %s1292_s26, %s1285_s13 }
  0x49   : > { %p1289_p8 = pneg %p1288_p3  ;;  %p1295_p2 = por %p1294_p0, %p1293_p6 }
  0x4b   : > { %p1296_p4 = pnand %p1295_p2, %p1289_p8 }
  0x4d   : > { %1299 = shalt.err (!%p1296_p4)
}
  0x4e   : > { %s1833_s18 = smov 128   ;;  %286 = sbr.rel (%p1561_p12) target bundleno = 699 (0x2bb), region = 36 }
  0x4f   : > { %1176 = dma.hbm_to_vmem [thread:$0]  (!%p1522_p13), %s1570_s29, 512, %s1574_s2, %s264_s16, %s1833_s18, %s1833_s18, %s1406_s7  }
  0x50   : > { %s1608_s17 = sand.u32 (!%p1561_p12), 1, %s1394_s22   ;;  %p1834_p6 = scmp.ne.s32.totalorder (!%p1561_p12), %s1827_s8, 0 }
  0x51   : > { %s1072_s12 = sshll.u32 (!%p1561_p12), %s1608_s17, 5  ;;  %s289_s28 = scalar_lea.sflag (!%p1561_p12), [#allocation3], %s1608_s17 }
  0x52   : > { %s1612_s19 = scalar_lea.vmem (!%p1561_p12), [#allocation2], %s1072_s12 }
  0x55   : > { %1373 = dma.done.wait (%p1834_p6), %s289_s28, 512  }
  0x56   : > { %1375 = vsyncadd (%p1834_p6), %s289_s28, 4294966784  ;;  %s298_s2 = scalar_lea.sflag [#allocation6], %s1608_s17  ;;  %s1619_s11 = scalar_lea.vmem [#allocation5], %s1072_s12 }
  0x57   : > { %1377 = dma.done.wait (%p1834_p6), %s298_s2, 512  }
  0x58   : > { %1379 = vsyncadd (%p1834_p6), %s298_s2, 4294966784  ;;  %p349_p13 = scmp.lt.s32.totalorder %s1469_s25, 1  ;;  %v1408_v0 = vmov 0.0   ;;  %vm1409_vm0 = vmmov 0   ;;  %v1410_v1 = vmov 0   ;;  %v376_v2 = vld [vmem:[%s1612_s19] sm:$0xff] }
  0x59   : > { %1114 = vmatprep.subr.bf16.mxu0 %v1408_v0  ;;  %1120 = vmatprep.subr.bf16.mxu1 %v1408_v0  ;;  %v379_v3 = vld [vmem:[%s1619_s11] sm:$0xff]  ;;  %v1079_v4 = vld [vmem:[%s1612_s19 + $0x8] sm:$0xff]  ;;  %v377_v5 = vmul.f32 0.59460354, %v376_v2  ;;  %vm382_vm1 = vcmask 64512   ;;  %v1083_v17 = vld [vmem:[%s1612_s19 + $0x10] sm:$0xff] }
  0x5a   : > { %1116 = vmatprep.mubr.msk.bf16.mxu0 %vm1409_vm0, %v1408_v0  ;;  %1122 = vmatprep.mubr.msk.bf16.mxu1 %vm1409_vm0, %v1408_v0  ;;  %s1633_s8 = scalar_select %p349_p13, %s1469_s25, 1  ;;  %v380_v6 = vmul.f32 0.59460354, %v379_v3  ;;  %v1080_v7 = vld [vmem:[%s1619_s11 + $0x8] sm:$0xff]  ;;  %v493_v10 = vmul.f32 0.59460354, %v1079_v4 }
  0x5b   : > { %1223 = vset.pattern.permute.xlu0 %v1410_v1  ;;  %v378_v8 = vpack.c.bf16 %v377_v5, %v377_v5  ;;  %v497_v11 = vmul.f32 0.59460354, %v1080_v7  ;;  %v1084_v18 = vld [vmem:[%s1619_s11 + $0x10] sm:$0xff]  ;;  %v609_v21 = vmul.f32 0.59460354, %v1083_v17  ;;  %v1087_v25 = vld [vmem:[%s1612_s19 + $0x18] sm:$0xff] }
  0x5c   : > { %s1075_s7 = sshll.u32 %s1633_s8, 3  ;;  %v381_v9 = vpack.c.bf16 %v380_v6, %v380_v6  ;;  %v494_v15 = vpack.c.bf16 %v493_v10, %v493_v10  ;;  %v613_v22 = vmul.f32 0.59460354, %v1084_v18  ;;  %v1088_v26 = vld [vmem:[%s1619_s11 + $0x18] sm:$0xff]  ;;  %v725_v29 = vmul.f32 0.59460354, %v1087_v25  ;;  %s351_s20 = scalar_lea.vmem %s1815_s0, %s1633_s8 }
  0x5d   : > { %s355_s16 = scalar_lea.vmem %s1816_s1, %s1075_s7  ;;  %v384_v13 = vsel %vm382_vm1, %v378_v8, 0  ;;  %v498_v16 = vpack.c.bf16 %v497_v11, %v497_v11  ;;  %v610_v23 = vpack.c.bf16 %v609_v21, %v609_v21  ;;  %v729_v30 = vmul.f32 0.59460354, %v1088_v26  ;;  %v1076_v36 = vld [vmem:[%s351_s20] ss:$0 sm:$0xff]  ;;  %s1074_s26 = sshll.u32 %s1608_s17, 3 }
  0x5e   : > { %v361_v12 = vld [vmem:[%s355_s16] sm:$0xff]  ;;  %v427_v14 = vsel %vm382_vm1, %v381_v9, 0  ;;  %1115 = vmatpush3.bf16.xpose.msra.mxu0 %v384_v13  ;;  %v500_v19 = vsel %vm382_vm1, %v494_v15, 0  ;;  %v614_v24 = vpack.c.bf16 %v613_v22, %v613_v22  ;;  %v726_v31 = vpack.c.bf16 %v725_v29, %v725_v29  ;;  %s1093_s18 = sshll.u32 %s1469_s25, 7  ;;  %s343_s12 = scalar_lea.vmem [#allocation8], %s1074_s26 }
  0x5f   : > { %364 = vperm.xlu0 %1223, %v361_v12   ;;  %1121 = vmatpush3.bf16.xpose.msra.mxu1 %v427_v14  ;;  %v543_v20 = vsel %vm382_vm1, %v498_v16, 0  ;;  %v616_v27 = vsel %vm382_vm1, %v610_v23, 0  ;;  %v730_v32 = vpack.c.bf16 %v729_v30, %v729_v30  ;;  %s898_s28 = sshll.u32 %s343_s12, 4  ;;  %s1734_s11 = scalar_lea.hbm %s1820_s5, %s1093_s18  ;;  %s1736_s28 = int_to_ptr.vmem [resolvable:$true] %s898_s28 }
  0x60   : > { %1126 = vmatprep.subr.bf16.mxu0 %v1408_v0  ;;  %1132 = vmatprep.subr.bf16.mxu1 %v1408_v0  ;;  %v659_v28 = vsel %vm382_vm1, %v614_v24, 0  ;;  %v732_v33 = vsel %vm382_vm1, %v726_v31, 0  ;;  %s869_s7 = scalar_lea.sflag [#allocation9], %s1608_s17  ;;  %s1300_s15 = scalar_lea.vmem %s1736_s28, 128 }
  0x61   : > { %v775_v34 = vsel %vm382_vm1, %v730_v32, 0  ;;  %p1301_p1 = scmp.ne.s32.totalorder %s1736_s28, %s1300_s15  ;;  %p1835_p12 = scmp.ne.s32.totalorder %s1828_s9, 0 }
  0x62   : > { %s1411_s29 = smov [#allocation8]  }
  0x63   : > { %p1302_p10 = pnand %p1301_p1, %p1835_p12  ;;  %s1304_s16 = sshll.u32 %s1411_s29, 4  ;;  %s1305_s16 = int_to_ptr.vmem [resolvable:$false] %s1304_s16 }
  0x64   : > { %s1306_s13 = scalar_lea.vmem %s1305_s16, 256  ;;  %p1307_p7 = scmp.lt.s32.totalorder %s1736_s28, %s1305_s16 }
  0x65   : > { %1117 = vmatmul.mubr.msk.bf16.vlgmr.msra.gmra.mrb[0].mxu0 %vm382_vm1, %v378_v8  ;;  %p1303_p5 = pneg %p1302_p10  ;;  %p1308_p9 = scmp.lt.s32.totalorder %s1306_s13, %s1300_s15 }
  0x66   : > { %1123 = vmatmul.mubr.msk.bf16.vlgmr.msra.gmra.mrb[0].mxu1 %vm382_vm1, %v381_v9  ;;  %1127 = vmatpush3.bf16.xpose.msra.mxu0 %v500_v19 }
  0x67   : > { %1133 = vmatpush3.bf16.xpose.msra.mxu1 %v543_v20  ;;  %1128 = vmatprep.mubr.msk.bf16.mxu0 %vm1409_vm0, %v1408_v0  ;;  %p1309_p11 = por %p1308_p9, %p1307_p7 }
  0x68   : > { %1134 = vmatprep.mubr.msk.bf16.mxu1 %vm1409_vm0, %v1408_v0  ;;  %1138 = vmatprep.subr.bf16.mxu0 %v1408_v0 }
  0x69   : > { %1144 = vmatprep.subr.bf16.mxu1 %v1408_v0  ;;  %p1310_p3 = pnand %p1309_p11, %p1303_p5 }
  0x6d   : > { %1129 = vmatmul.mubr.msk.bf16.vlgmr.msra.gmra.mrb[4].mxu0 %vm382_vm1, %v494_v15 }
  0x6e   : > { %1135 = vmatmul.mubr.msk.bf16.vlgmr.msra.gmra.mrb[4].mxu1 %vm382_vm1, %v498_v16  ;;  %1139 = vmatpush3.bf16.xpose.msra.mxu0 %v616_v27 }
  0x6f   : > { %1145 = vmatpush3.bf16.xpose.msra.mxu1 %v659_v28  ;;  %1140 = vmatprep.mubr.msk.bf16.mxu0 %vm1409_vm0, %v1408_v0 }
  0x70   : > { %1146 = vmatprep.mubr.msk.bf16.mxu1 %vm1409_vm0, %v1408_v0  ;;  %1150 = vmatprep.subr.bf16.mxu0 %v1408_v0 }
  0x71   : > { %1156 = vmatprep.subr.bf16.mxu1 %v1408_v0 }
  0x75   : > { %1141 = vmatmul.mubr.msk.bf16.vlgmr.msra.gmra.mrb[8].mxu0 %vm382_vm1, %v610_v23 }
  0x76   : > { %1147 = vmatmul.mubr.msk.bf16.vlgmr.msra.gmra.mrb[8].mxu1 %vm382_vm1, %v614_v24  ;;  %1151 = vmatpush3.bf16.xpose.msra.mxu0 %v732_v33 }
  0x77   : > { %1157 = vmatpush3.bf16.xpose.msra.mxu1 %v775_v34  ;;  %1152 = vmatprep.mubr.msk.bf16.mxu0 %vm1409_vm0, %v1408_v0 }
  0x78   : > { %1158 = vmatprep.mubr.msk.bf16.mxu1 %vm1409_vm0, %v1408_v0 }
  0x7d   : > { %1153 = vmatmul.mubr.msk.bf16.vlgmr.msra.gmra.mrb[12].mxu0 %vm382_vm1, %v726_v31 }
  0x7e   : > { %1159 = vmatmul.mubr.msk.bf16.vlgmr.msra.gmra.mrb[12].mxu1 %vm382_vm1, %v730_v32 }
  0xde   : > { %v365_v35 = vpop.permute.xlu0 %364 }
  0xdf   : > { %v1685_v37 = vmul.f32 %v1076_v36, %v365_v35 }
  0xe1   : > { %v374_v38 = vsub.f32 1.0, %v1685_v37 }
  0xe3   : > { %v375_v39 = vmul.f32 -10000.0, %v374_v38 }
 0x138   : > { %v1688_v40 = vpop.f32.mrb[0].mxu0 }
 0x139   : > { %v1690_v41 = vpop.f32.mrb[0].mxu1  ;;  %v476_v42 = vmul.f32 %v1688_v40, %v1685_v37  ;;  %v1118_v43 = vpop.f32.mrb[1].mxu0 }
 0x13a   : > { %v469_v44 = vsub.f32 %v1690_v41, %v1688_v40  ;;  %v1124_v45 = vpop.f32.mrb[1].mxu1  ;;  %v423_v46 = vpop.f32.mrb[2].mxu0 }
 0x13b   : > { %v466_v47 = vpop.f32.mrb[2].mxu1  ;;  %v1119_v48 = vpop.f32.mrb[3].mxu0  ;;  %v477_v49 = vadd.f32 %v476_v42, %v375_v39 }
 0x13c   : > { %v1125_v50 = vpop.f32.mrb[3].mxu1 }
 0x13d   : > { %v478_v51 = vsel %vm382_vm1, %v477_v49, -inf }
 0x13e   : > { %479 = vmax.xlane.f32.xlu0 %v478_v51 }
 0x140   : > { %v1697_v52 = vpop.f32.mrb[4].mxu0 }
 0x141   : > { %v1699_v53 = vpop.f32.mrb[4].mxu1  ;;  %v592_v54 = vmul.f32 %v1697_v52, %v1685_v37  ;;  %v1130_v55 = vpop.f32.mrb[5].mxu0 }
 0x142   : > { %v585_v56 = vsub.f32 %v1699_v53, %v1697_v52  ;;  %v1136_v57 = vpop.f32.mrb[5].mxu1  ;;  %v539_v58 = vpop.f32.mrb[6].mxu0 }
 0x143   : > { %v582_v59 = vpop.f32.mrb[6].mxu1  ;;  %v1131_v60 = vpop.f32.mrb[7].mxu0  ;;  %v593_v61 = vadd.f32 %v592_v54, %v375_v39 }
 0x144   : > { %v1137_v62 = vpop.f32.mrb[7].mxu1  ;;  %v586_v51 = vmul.f32 %v585_v56, %v1685_v37 }
 0x145   : > { %v594_v63 = vsel %vm382_vm1, %v593_v61, -inf }
 0x146   : > { %595 = vmax.xlane.f32.xlu1 %v594_v63  ;;  %v587_v59 = vmul.f32 %v586_v51, %v586_v51 }
 0x148   : > { %v652_v0 = vpop.f32.mrb[8].mxu0  ;;  %v588_v60 = vsel %vm382_vm1, %v587_v59, 0.0 }
 0x149   : > { %v695_v1 = vpop.f32.mrb[8].mxu1  ;;  %v708_v2 = vmul.f32 %v652_v0, %v1685_v37  ;;  %v1142_v4 = vpop.f32.mrb[9].mxu0 }
 0x14a   : > { %v701_v3 = vsub.f32 %v695_v1, %v652_v0  ;;  %v1148_v5 = vpop.f32.mrb[9].mxu1  ;;  %v655_v6 = vpop.f32.mrb[10].mxu0 }
 0x14b   : > { %v698_v7 = vpop.f32.mrb[10].mxu1  ;;  %v1143_v9 = vpop.f32.mrb[11].mxu0  ;;  %v709_v10 = vadd.f32 %v708_v2, %v375_v39  ;;  %v849_v2 = vlaneseq }
 0x14c   : > { %v702_v8 = vmul.f32 %v701_v3, %v1685_v37  ;;  %v1149_v11 = vpop.f32.mrb[11].mxu1 }
 0x14d   : > { %v710_v12 = vsel %vm382_vm1, %v709_v10, -inf  ;;  %v850_v11 = vshrl.u32 %v849_v2, 7 }
 0x14e   : > { %v703_v13 = vmul.f32 %v702_v8, %v702_v8  ;;  %711 = vmax.xlane.f32.xlu1 %v710_v12  ;;  %v852_v12 = vand.u32 127, %v849_v2 }
 0x150   : > { %v704_v14 = vsel %vm382_vm1, %v703_v13, 0.0  ;;  %v768_v15 = vpop.f32.mrb[12].mxu0  ;;  %vm853_vm2 = vcmp.eq.s32.totalorder %v850_v11, %v852_v12 }
 0x151   : > { %v811_v16 = vpop.f32.mrb[12].mxu1  ;;  %705 = vadd.xlane.f32.xlu0 %v704_v14  ;;  %v824_v17 = vmul.f32 %v768_v15, %v1685_v37  ;;  %v1154_v19 = vpop.f32.mrb[13].mxu0 }
 0x152   : > { %v817_v18 = vsub.f32 %v811_v16, %v768_v15  ;;  %v1160_v20 = vpop.f32.mrb[13].mxu1  ;;  %v771_v21 = vpop.f32.mrb[14].mxu0 }
 0x153   : > { %v814_v22 = vpop.f32.mrb[14].mxu1  ;;  %v1155_v23 = vpop.f32.mrb[15].mxu0  ;;  %v825_v24 = vadd.f32 %v824_v17, %v375_v39 }
 0x154   : > { %v1161_v25 = vpop.f32.mrb[15].mxu1  ;;  %v818_v57 = vmul.f32 %v817_v18, %v1685_v37 }
 0x155   : > { %v826_v26 = vsel %vm382_vm1, %v825_v24, -inf }
 0x156   : > { %827 = vmax.xlane.f32.xlu1 %v826_v26  ;;  %v819_v40 = vmul.f32 %v818_v57, %v818_v57 }
 0x158   : > { %v820_v41 = vsel %vm382_vm1, %v819_v40, 0.0 }
 0x1cb   : > { %v480_v27 = vpop.xlane.xlu0 %479 }
 0x1cc   : > { %v481_v28 = vsub.f32 %v477_v49, %v480_v27  ;;  %v470_v49 = vmul.f32 %v469_v44, %v1685_v37 }
 0x1ce   : > { %v482_v29 = vmul.f32 1.442695, %v481_v28  ;;  %v471_v55 = vmul.f32 %v470_v49, %v470_v49 }
 0x1d0   : > { %1224 = vpow2.f32 %v482_v29  ;;  %v472_v58 = vsel %vm382_vm1, %v471_v55, 0.0 }
 0x1d3   : > { %v596_v30 = vpop.xlane.xlu1 %595 }
 0x1d4   : > { %v597_v31 = vsub.f32 %v593_v61, %v596_v30 }
 0x1d6   : > { %v598_v32 = vmul.f32 1.442695, %v597_v31 }
 0x1d8   : > { %1226 = vpow2.f32 %v598_v32 }
 0x1da   : > { %v1225_v33 = vpop.eup %1224 }
 0x1db   : > { %v712_v34 = vpop.xlane.xlu1 %711  ;;  %v484_v35 = vsel %vm382_vm1, %v1225_v33, 0.0 }
 0x1dc   : > { %v713_v36 = vsub.f32 %v709_v10, %v712_v34  ;;  %485 = vadd.xlane.f32.xlu1 %v484_v35 }
 0x1de   : > { %v714_v38 = vmul.f32 1.442695, %v713_v36  ;;  %v706_v7 = vpop.xlane.xlu0 %705 }
 0x1e0   : > { %1228 = vpow2.f32 %v714_v38 }
 0x1e2   : > { %v1227_v39 = vpop.eup %1226 }
 0x1e3   : > { %v828_v42 = vpop.xlane.xlu1 %827  ;;  %v600_v43 = vsel %vm382_vm1, %v1227_v39, 0.0 }
 0x1e4   : > { %v829_v45 = vsub.f32 %v825_v24, %v828_v42  ;;  %601 = vadd.xlane.f32.xlu1 %v600_v43 }
 0x1e6   : > { %v830_v46 = vmul.f32 1.442695, %v829_v45 }
 0x1e8   : > { %1230 = vpow2.f32 %v830_v46 }
 0x1ea   : > { %v1229_v47 = vpop.eup %1228 }
 0x1eb   : > { %v716_v48 = vsel %vm382_vm1, %v1229_v47, 0.0 }
 0x1ec   : > { %717 = vadd.xlane.f32.xlu1 %v716_v48 }
 0x1f2   : > { %v1231_v50 = vpop.eup %1230 }
 0x1f3   : > { %v832_v54 = vsel %vm382_vm1, %v1231_v50, 0.0 }
 0x1f4   : > { %833 = vadd.xlane.f32.xlu1 %v832_v54 }
 0x1f8   : > { %473 = vadd.xlane.f32.xlu1 %v472_v58 }
 0x1fc   : > { %589 = vadd.xlane.f32.xlu1 %v588_v60 }
 0x200   : > { %821 = vadd.xlane.f32.xlu1 %v820_v41 }
 0x269   : > { %v486_v44 = vpop.xlane.xlu1 %485 }
 0x271   : > { %v602_v52 = vpop.xlane.xlu1 %601 }
 0x272   : > { %1232 = vrcp.f32 %v602_v52 }
 0x273   : > { %1234 = vrcp.f32 %v486_v44 }
 0x279   : > { %v718_v53 = vpop.xlane.xlu1 %717 }
 0x27a   : > { %1236 = vrcp.f32 %v718_v53 }
 0x27c   : > { %v1233_v61 = vpop.eup %1232 }
 0x27d   : > { %v1235_v62 = vpop.eup %1234  ;;  %v605_v1 = vmul.f32 %v1233_v61, %v1227_v39 }
 0x27e   : > { %v489_v3 = vmul.f32 %v1235_v62, %v1225_v33 }
 0x280   : > { %v606_v8 = vadd.f32 %v605_v1, %v489_v3 }
 0x281   : > { %v834_v56 = vpop.xlane.xlu1 %833 }
 0x282   : > { %1238 = vrcp.f32 %v834_v56 }
 0x284   : > { %v1237_v0 = vpop.eup %1236 }
 0x285   : > { %v474_v63 = vpop.xlane.xlu1 %473  ;;  %v721_v4 = vmul.f32 %v1237_v0, %v1229_v47 }
 0x287   : > { %v722_v13 = vadd.f32 %v721_v4, %v606_v8 }
 0x289   : > { %v590_v5 = vpop.xlane.xlu1 %589 }
 0x28a   : > { %v591_v6 = vadd.f32 %v590_v5, %v474_v63 }
 0x28c   : > { %v1239_v9 = vpop.eup %1238  ;;  %v707_v10 = vadd.f32 %v706_v7, %v591_v6 }
 0x28d   : > { %v837_v14 = vmul.f32 %v1239_v9, %v1231_v50  ;;  %v822_v15 = vpop.xlane.xlu1 %821 }
 0x28e   : > { %v823_v16 = vadd.f32 %v822_v15, %v707_v10 }
 0x28f   : > { %v838_v17 = vadd.f32 %v837_v14, %v722_v13 }
 0x290   : > { %v856_v18 = vrot.slane %v823_v16, 4 }
 0x291   : > { %v839_v19 = vmul.f32 %v838_v17, %v1685_v37 }
 0x292   : > { %v857_v20 = vadd.f32 %v856_v18, %v823_v16 }
 0x293   : > { %v840_v21 = vsel %vm382_vm1, %v839_v19, 0.0  ;;  %v854_v22 = vsel %vm853_vm2, 0.0, %v839_v19 }
 0x294   : > { %v841_v23 = vrot.slane %v840_v21, 4  ;;  %v858_v24 = vrot.slane %v857_v20, 2  ;;  %855 = vst.msk [vmem:[%s343_s12] sm:$0xff] %vm382_vm1, %v854_v22 }
 0x295   : > { %1313 = shalt.err (!%p1310_p3)
}
 0x296   : > { %s1314_s14 = scalar_lea.hbm %s1734_s11, 128  ;;  %s1318_s18 = scalar_lea.hbm %s1820_s5, 256 }
 0x297   : > { %p1315_p8 = scmp.ne.s32.totalorder %s1734_s11, %s1314_s14  ;;  %p1319_p4 = scmp.lt.u32.totalorder %s1734_s11, %s1820_s5 }
 0x298   : > { %p1320_p6 = scmp.lt.u32.totalorder %s1318_s18, %s1314_s14  ;;  %p1322_p1 = scmp.lt.u32.totalorder %s1314_s14, %s1734_s11 }
 0x299   : > { %p1316_p0 = pnand %p1315_p8, %p1835_p12 }
 0x29a   : > { %p1321_p13 = por %p1320_p6, %p1319_p4 }
 0x29b   : > { %p1317_p2 = pneg %p1316_p0 }
 0x29c   : > { %p1323_p10 = por %p1322_p1, %p1321_p13 }
 0x29e   : > { %p1324_p5 = pnand %p1323_p10, %p1317_p2 }
 0x2a0   : > { %1327 = shalt.err (!%p1324_p5)
}
 0x2a1   : > { %1167 = dma.vmem_to_hbm [thread:$0]  (%p1835_p12), %s1736_s28, 128, %s1734_s11, %s869_s7   ;;  %v859_v37 = vadd.f32 %v858_v24, %v857_v20  ;;  %v842_v25 = vadd.f32 %v841_v23, %v840_v21  ;;  %vm862_vm3 = vcmask 0   ;;  %vm847_vm4 = vcmask 57344  }
 0x2a2   : > { %s358_s29 = scalar_lea.vmem %s1821_s6, %s1633_s8  ;;  %s1092_s16 = sshll.u32 %s1469_s25, 4 }
 0x2a3   : > { %v860_v26 = vrot.slane %v859_v37, 1  ;;  %v843_v27 = vrot.slane %v842_v25, 2  ;;  %s336_s13 = scalar_lea.vmem [#allocation7], %s1608_s17  ;;  %s1771_s7 = scalar_lea.hbm %s1819_s4, %s1092_s16 }
 0x2a4   : > { %s885_s14 = sshll.u32 %s336_s13, 4  ;;  %s865_s8 = scalar_lea.sflag [#allocation4], %s1608_s17  ;;  %s1773_s14 = int_to_ptr.vmem [resolvable:$true] %s885_s14 }
 0x2a5   : > { %v861_v28 = vadd.f32 %v860_v26, %v859_v37  ;;  %v844_v29 = vadd.f32 %v843_v27, %v842_v25  ;;  %s1328_s20 = scalar_lea.vmem %s1773_s14, 16  ;;  %s1412_s25 = smov [#allocation7]  }
 0x2a6   : > { %p1329_p7 = scmp.ne.s32.totalorder %s1773_s14, %s1328_s20  ;;  %s1332_s26 = sshll.u32 %s1412_s25, 4  ;;  %s1333_s26 = int_to_ptr.vmem [resolvable:$false] %s1332_s26 }
 0x2a7   : > { %863 = vst.msk [vmem:[%s358_s29] sm:$0x1] %vm862_vm3, %v861_v28  ;;  %v845_v30 = vrot.slane %v844_v29, 1  ;;  %s1334_s18 = scalar_lea.vmem %s1333_s26, 32  ;;  %p1335_p3 = scmp.lt.s32.totalorder %s1773_s14, %s1333_s26 }
 0x2a8   : > { %p1330_p9 = pnand %p1329_p7, %p1835_p12  ;;  %p1336_p8 = scmp.lt.s32.totalorder %s1334_s18, %s1328_s20 }
 0x2a9   : > { %v846_v31 = vadd.f32 %v845_v30, %v844_v29 }
 0x2aa   : > { %p1331_p11 = pneg %p1330_p9  ;;  %p1337_p0 = por %p1336_p8, %p1335_p3 }
 0x2ab   : > { %848 = vst.msk [vmem:[%s336_s13] sm:$0x1] %vm847_vm4, %v846_v31 }
 0x2ac   : > { %p1338_p2 = pnand %p1337_p0, %p1331_p11 }
 0x2ae   : > { %1341 = shalt.err (!%p1338_p2)
}
 0x2af   : > { %s1342_s17 = scalar_lea.hbm %s1771_s7, 16  ;;  %s1346_s2 = scalar_lea.hbm %s1819_s4, 32 }
 0x2b0   : > { %p1343_p4 = scmp.ne.s32.totalorder %s1771_s7, %s1342_s17  ;;  %p1347_p1 = scmp.lt.u32.totalorder %s1771_s7, %s1819_s4 }
 0x2b1   : > { %p1348_p10 = scmp.lt.u32.totalorder %s1346_s2, %s1342_s17  ;;  %p1350_p7 = scmp.lt.u32.totalorder %s1342_s17, %s1771_s7 }
 0x2b2   : > { %p1344_p6 = pnand %p1343_p4, %p1835_p12 }
 0x2b3   : > { %p1349_p5 = por %p1348_p10, %p1347_p1 }
 0x2b4   : > { %p1345_p13 = pneg %p1344_p6 }
 0x2b5   : > { %p1351_p9 = por %p1350_p7, %p1349_p5 }
 0x2b7   : > { %p1352_p11 = pnand %p1351_p9, %p1345_p13 }
 0x2b9   : > { %1355 = shalt.err (!%p1352_p11)
}
 0x2ba   : > { %1166 = dma.vmem_to_hbm [thread:$0]  (%p1835_p12), %s1773_s14, 16, %s1771_s7, %s865_s8  }
 0x2bb PF: > { %s913_s16 = sand.u32 1, %s1390_s21   ;;  %p1836_p3 = scmp.ne.s32.totalorder %s1829_s10, 0 }
 0x2bc   : > { %p1837_p8 = scmp.ge.s32.totalorder %s1402_s24, 2  ;;  %s914_s13 = scalar_lea.sflag [#allocation4], %s913_s16 }
 0x2be   : > { %p1178_p0 = pnand %p1837_p8, %p1836_p3 }
 0x2c0   : > { %1381 = dma.done.wait (!%p1178_p0), %s914_s13, 16  }
 0x2c1   : > { %1383 = vsyncadd (!%p1178_p0), %s914_s13, 4294967280  ;;  %s922_s28 = scalar_lea.sflag [#allocation9], %s913_s16 }
 0x2c2   : > { %1385 = dma.done.wait (!%p1178_p0), %s922_s28, 128  }
 0x2c3   : > { %1387 = vsyncadd (!%p1178_p0), %s922_s28, 4294967168  ;;  %p26_p12 = scmp.ge.s32.totalorder %s1473_s27, 4   ;;  %s1838_s21 = smov %s1394_s22 }
 0x2c4   : > { %s1839_s22 = smov %s1398_s23  ;;  %s1840_s23 = smov %s1485_s30 }
 0x2c5   : > { %s1841_s24 = smov %s1473_s27  ;;  %28 = sbr.rel (!%p26_p12) target bundleno = 11 (0xb), region = 135 }
 0x2cc   :  { %933 = vsyncpa [#allocation3], 1 }
 0x2cd   :  { %935 = vsyncpa [#allocation3 + $0x1], 1 }
 0x2ce   :  { %936 = vsyncpa [#allocation6], 1 }
 0x2cf   :  { %938 = vsyncpa [#allocation6 + $0x1], 1 }
 0x2d0   :  { %939 = vsyncpa [#allocation4], 1 }
 0x2d1   :  { %941 = vsyncpa [#allocation4 + $0x1], 1 }
 0x2d2   :  { %942 = vsyncpa [#allocation9], 1 }
 0x2d3   :  { %944 = vsyncpa [#allocation9 + $0x1], 1 }

</bundles_post_ra>
